<compile_context>
chip_gen: v7x
topology: tpu7x:2x2x1
jax: 0.10.0
libtpu: 0.0.40
codegen_flags: <defaults>
</compile_context>

<pallas_src>
import jax
import jax.numpy as jnp
from jax.experimental import pallas as pl
from jax.experimental.pallas import tpu as pltpu


def _round_up(x, m):
    return ((x + m - 1) // m) * m


# --------------------------------------------------------------------------- #
# Kernel
# --------------------------------------------------------------------------- #
def mlp_kernel(x_ref,
               w1_ref, sh1_ref,
               w2_ref, sh2_ref,
               w3_ref, sh3_ref,
               w4_ref, sh4_ref,
               o_ref):
    # Layer 1: Linear(input_dim, 512) [BN folded into W/shift] + ReLU
    x = x_ref[...].astype(jnp.bfloat16)
    h = jnp.dot(x, w1_ref[...], preferred_element_type=jnp.float32)
    h = jnp.maximum(h + sh1_ref[...], 0.0)

    # Layer 2: Linear(512, 256) [BN folded] + ReLU
    h = jnp.dot(h.astype(jnp.bfloat16), w2_ref[...],
                preferred_element_type=jnp.float32)
    h = jnp.maximum(h + sh2_ref[...], 0.0)

    # Layer 3: Linear(256, 256) [BN folded] + ReLU
    h = jnp.dot(h.astype(jnp.bfloat16), w3_ref[...],
                preferred_element_type=jnp.float32)
    h = jnp.maximum(h + sh3_ref[...], 0.0)

    # Layer 4: Linear(256, 1)
    out = jnp.dot(h.astype(jnp.bfloat16), w4_ref[...],
                  preferred_element_type=jnp.float32)
    o_ref[...] = (out + sh4_ref[...]).astype(o_ref.dtype)


# --------------------------------------------------------------------------- #
# Parameter init / preprocessing (done once, outside the per-batch path)
# --------------------------------------------------------------------------- #
def init_params(key, input_dim):
    """Deterministic params mimicking PyTorch Linear/BatchNorm1d defaults."""
    dims = [(input_dim, 512), (512, 256), (256, 256), (256, 1)]
    params = {}
    for li, (fan_in, fan_out) in enumerate(dims, start=1):
        key, kw, kb = jax.random.split(key, 3)
        bound = 1.0 / jnp.sqrt(fan_in)
        params[f"w{li}"] = jax.random.uniform(kw, (fan_in, fan_out),
                                              jnp.float32, -bound, bound)
        params[f"b{li}"] = jax.random.uniform(kb, (fan_out,),
                                              jnp.float32, -bound, bound)
    for li, feat in zip((1, 2, 3), (512, 256, 256)):
        params[f"bn{li}_gamma"] = jnp.ones((feat,), jnp.float32)
        params[f"bn{li}_beta"] = jnp.zeros((feat,), jnp.float32)
        params[f"bn{li}_mean"] = jnp.zeros((feat,), jnp.float32)
        params[f"bn{li}_var"] = jnp.ones((feat,), jnp.float32)
    return params


def _fold_bn_into_weight(w, b, gamma, beta, mean, var, eps=1e-5):
    """Eval-mode BN fold: (x@W + b - mean)*s + beta == x@(W*s) + shift."""
    scale = gamma / jnp.sqrt(var + eps)
    w_scaled = w * scale[None, :]
    shift = (b - mean) * scale + beta
    return w_scaled, shift[None, :]


def prepare_params(params):
    """One-time fold of BN into weights + bf16 cast of the matmul operands."""
    w1, sh1 = _fold_bn_into_weight(params["w1"], params["b1"],
                                   params["bn1_gamma"], params["bn1_beta"],
                                   params["bn1_mean"], params["bn1_var"])
    w2, sh2 = _fold_bn_into_weight(params["w2"], params["b2"],
                                   params["bn2_gamma"], params["bn2_beta"],
                                   params["bn2_mean"], params["bn2_var"])
    w3, sh3 = _fold_bn_into_weight(params["w3"], params["b3"],
                                   params["bn3_gamma"], params["bn3_beta"],
                                   params["bn3_mean"], params["bn3_var"])
    return {
        "w1": w1.astype(jnp.bfloat16), "sh1": sh1,
        "w2": w2.astype(jnp.bfloat16), "sh2": sh2,
        "w3": w3.astype(jnp.bfloat16), "sh3": sh3,
        "w4": params["w4"].astype(jnp.bfloat16),
        "sh4": params["b4"][None, :],
    }


# --------------------------------------------------------------------------- #
# Wrapper
# --------------------------------------------------------------------------- #
def mlp_forward(x, fp, tb=256):
    """Batch-tiled Pallas forward. fp = prepare_params(params)."""
    batch, input_dim = x.shape
    # Tile size: multiple of 8 (sublane), capped at the (padded) batch.
    tb = min(tb, _round_up(batch, 8))
    padded = _round_up(batch, tb)
    if padded != batch:
        x = jnp.pad(x, ((0, padded - batch), (0, 0)))
    grid = (padded // tb,)

    tile_map = lambda i: (i, 0)     # batch-tiled operands
    const_map = lambda i: (0, 0)    # VMEM-resident weights / shifts

    def resident(arr):
        return pl.BlockSpec(arr.shape, const_map)

    in_specs = [
        pl.BlockSpec((tb, input_dim), tile_map),
        resident(fp["w1"]), resident(fp["sh1"]),
        resident(fp["w2"]), resident(fp["sh2"]),
        resident(fp["w3"]), resident(fp["sh3"]),
        resident(fp["w4"]), resident(fp["sh4"]),
    ]

    out = pl.pallas_call(
        mlp_kernel,
        out_shape=jax.ShapeDtypeStruct((padded, 1), jnp.float32),
        grid=grid,
        in_specs=in_specs,
        out_specs=pl.BlockSpec((tb, 1), tile_map),
        compiler_params=pltpu.CompilerParams(
            dimension_semantics=("parallel",)),
    )(x,
      fp["w1"], fp["sh1"],
      fp["w2"], fp["sh2"],
      fp["w3"], fp["sh3"],
      fp["w4"], fp["sh4"])

    return out[:batch]


# --------------------------------------------------------------------------- #
# References
# --------------------------------------------------------------------------- #
def mlp_reference_bf16(x, fp):
    """Plain-JAX reference matching the kernel's bf16-matmul / f32-accumulate."""
    def layer(h, w, sh, relu):
        y = jnp.dot(h.astype(jnp.bfloat16), w,
                    preferred_element_type=jnp.float32) + sh
        return jnp.maximum(y, 0.0) if relu else y
    h = layer(x, fp["w1"], fp["sh1"], True)
    h = layer(h, fp["w2"], fp["sh2"], True)
    h = layer(h, fp["w3"], fp["sh3"], True)
    return layer(h, fp["w4"], fp["sh4"], False)


def mlp_reference_f32(x, params):
    """Full-precision reference of the original inference-mode forward."""
    def bn(h, li):
        s = params[f"bn{li}_gamma"] / jnp.sqrt(params[f"bn{li}_var"] + 1e-5)
        return (h - params[f"bn{li}_mean"]) * s + params[f"bn{li}_beta"]
    h = jnp.maximum(bn(x @ params["w1"] + params["b1"], 1), 0.0)
    h = jnp.maximum(bn(h @ params["w2"] + params["b2"], 2), 0.0)
    h = jnp.maximum(bn(h @ params["w3"] + params["b3"], 3), 0.0)
    return h @ params["w4"] + params["b4"][None, :]


# --------------------------------------------------------------------------- #
if __name__ == "__main__":
    key = jax.random.PRNGKey(0)
    batch, input_dim = 20, 32          # non-multiple-of-8 batch exercises padding
    kx, kp = jax.random.split(key)
    x = jax.random.normal(kx, (batch, input_dim), jnp.float32)
    params = init_params(kp, input_dim)
    folded = prepare_params(params)

    # tb=8 at this tiny shape forces a multi-step grid (3 steps) to exercise
    # the tiled/pipelined path; real deployments use the default tb=256.
    out = mlp_forward(x, folded, tb=8)
    out = jax.block_until_ready(out)
    assert out.shape == (batch, 1)

    ref_bf16 = mlp_reference_bf16(x, folded)
    assert jnp.allclose(out, ref_bf16, atol=1e-3, rtol=1e-3), (
        float(jnp.max(jnp.abs(out - ref_bf16))))

    # Informational only: bf16-matmul kernel vs full-f32 module forward.
    ref_f32 = mlp_reference_f32(x, params)
    _ = float(jnp.max(jnp.abs(out - ref_f32)))   # small (bf16 rounding) by design

    print("KERNEL_OK")
</pallas_src>

<mosaic_0001>
module attributes {stable_mosaic.version = 11 : i64} {
  func.func @mlp_kernel(%arg0: i32, %arg1: memref<8x32xf32, #tpu.memory_space<vmem>>, %arg2: memref<32x512xbf16, #tpu.memory_space<vmem>>, %arg3: memref<1x512xf32, #tpu.memory_space<vmem>>, %arg4: memref<512x256xbf16, #tpu.memory_space<vmem>>, %arg5: memref<1x256xf32, #tpu.memory_space<vmem>>, %arg6: memref<256x256xbf16, #tpu.memory_space<vmem>>, %arg7: memref<1x256xf32, #tpu.memory_space<vmem>>, %arg8: memref<256x1xbf16, #tpu.memory_space<vmem>>, %arg9: memref<1x1xf32, #tpu.memory_space<vmem>>, %arg10: memref<8x1xf32, #tpu.memory_space<vmem>>) attributes {dimension_semantics = [#tpu.dimension_semantics<parallel>], iteration_bounds = array<i64: 3>, scalar_prefetch = 0 : i64, scratch_operands = 0 : i64, tpu.core_type = #tpu.core_type<tc>, window_params = [{transform_indices = @transform_0, window_bounds = array<i64: 8, 32>}, {pipeline_mode = #tpu.pipeline_mode<synchronous>, transform_indices = @transform_1, window_bounds = array<i64: 32, 512>}, {pipeline_mode = #tpu.pipeline_mode<synchronous>, transform_indices = @transform_2, window_bounds = array<i64: 1, 512>}, {pipeline_mode = #tpu.pipeline_mode<synchronous>, transform_indices = @transform_3, window_bounds = array<i64: 512, 256>}, {pipeline_mode = #tpu.pipeline_mode<synchronous>, transform_indices = @transform_4, window_bounds = array<i64: 1, 256>}, {pipeline_mode = #tpu.pipeline_mode<synchronous>, transform_indices = @transform_5, window_bounds = array<i64: 256, 256>}, {pipeline_mode = #tpu.pipeline_mode<synchronous>, transform_indices = @transform_6, window_bounds = array<i64: 1, 256>}, {pipeline_mode = #tpu.pipeline_mode<synchronous>, transform_indices = @transform_7, window_bounds = array<i64: 256, 1>}, {pipeline_mode = #tpu.pipeline_mode<synchronous>, transform_indices = @transform_8, window_bounds = array<i64: 1, 1>}, {transform_indices = @transform_9, window_bounds = array<i64: 8, 1>}]} {
    %c0 = arith.constant 0 : index
    %c0_0 = arith.constant 0 : index
    %0 = vector.load %arg1[%c0, %c0_0] : memref<8x32xf32, #tpu.memory_space<vmem>>, vector<8x32xf32>
    %1 = arith.truncf %0 : vector<8x32xf32> to vector<8x32xbf16>
    %c0_1 = arith.constant 0 : index
    %c0_2 = arith.constant 0 : index
    %2 = vector.load %arg2[%c0_1, %c0_2] : memref<32x512xbf16, #tpu.memory_space<vmem>>, vector<32x512xbf16>
    %cst = arith.constant dense<0.000000e+00> : vector<8x512xf32>
    %3 = tpu.matmul %1, %2, %cst {dimension_numbers = #tpu.dot_dimension_numbers<[1], [0], [0], [1], [0, 0, 1, 1], [], []>} : vector<8x32xbf16>, vector<32x512xbf16>, vector<8x512xf32> -> vector<8x512xf32>
    %c0_3 = arith.constant 0 : index
    %c0_4 = arith.constant 0 : index
    %4 = vector.load %arg3[%c0_3, %c0_4] : memref<1x512xf32, #tpu.memory_space<vmem>>, vector<1x512xf32>
    %5 = vector.broadcast %4 : vector<1x512xf32> to vector<8x512xf32>
    %6 = arith.addf %3, %5 : vector<8x512xf32>
    %cst_5 = arith.constant 0.000000e+00 : f32
    %7 = vector.broadcast %cst_5 : f32 to vector<8x512xf32>
    %8 = arith.maximumf %6, %7 : vector<8x512xf32>
    %9 = arith.truncf %8 : vector<8x512xf32> to vector<8x512xbf16>
    %c0_6 = arith.constant 0 : index
    %c0_7 = arith.constant 0 : index
    %10 = vector.load %arg4[%c0_6, %c0_7] : memref<512x256xbf16, #tpu.memory_space<vmem>>, vector<512x256xbf16>
    %cst_8 = arith.constant dense<0.000000e+00> : vector<8x256xf32>
    %11 = tpu.matmul %9, %10, %cst_8 {dimension_numbers = #tpu.dot_dimension_numbers<[1], [0], [0], [1], [0, 0, 1, 1], [], []>} : vector<8x512xbf16>, vector<512x256xbf16>, vector<8x256xf32> -> vector<8x256xf32>
    %c0_9 = arith.constant 0 : index
    %c0_10 = arith.constant 0 : index
    %12 = vector.load %arg5[%c0_9, %c0_10] : memref<1x256xf32, #tpu.memory_space<vmem>>, vector<1x256xf32>
    %13 = vector.broadcast %12 : vector<1x256xf32> to vector<8x256xf32>
    %14 = arith.addf %11, %13 : vector<8x256xf32>
    %cst_11 = arith.constant 0.000000e+00 : f32
    %15 = vector.broadcast %cst_11 : f32 to vector<8x256xf32>
    %16 = arith.maximumf %14, %15 : vector<8x256xf32>
    %17 = arith.truncf %16 : vector<8x256xf32> to vector<8x256xbf16>
    %c0_12 = arith.constant 0 : index
    %c0_13 = arith.constant 0 : index
    %18 = vector.load %arg6[%c0_12, %c0_13] : memref<256x256xbf16, #tpu.memory_space<vmem>>, vector<256x256xbf16>
    %cst_14 = arith.constant dense<0.000000e+00> : vector<8x256xf32>
    %19 = tpu.matmul %17, %18, %cst_14 {dimension_numbers = #tpu.dot_dimension_numbers<[1], [0], [0], [1], [0, 0, 1, 1], [], []>} : vector<8x256xbf16>, vector<256x256xbf16>, vector<8x256xf32> -> vector<8x256xf32>
    %c0_15 = arith.constant 0 : index
    %c0_16 = arith.constant 0 : index
    %20 = vector.load %arg7[%c0_15, %c0_16] : memref<1x256xf32, #tpu.memory_space<vmem>>, vector<1x256xf32>
    %21 = vector.broadcast %20 : vector<1x256xf32> to vector<8x256xf32>
    %22 = arith.addf %19, %21 : vector<8x256xf32>
    %cst_17 = arith.constant 0.000000e+00 : f32
    %23 = vector.broadcast %cst_17 : f32 to vector<8x256xf32>
    %24 = arith.maximumf %22, %23 : vector<8x256xf32>
    %25 = arith.truncf %24 : vector<8x256xf32> to vector<8x256xbf16>
    %c0_18 = arith.constant 0 : index
    %c0_19 = arith.constant 0 : index
    %26 = vector.load %arg8[%c0_18, %c0_19] : memref<256x1xbf16, #tpu.memory_space<vmem>>, vector<256x1xbf16>
    %cst_20 = arith.constant dense<0.000000e+00> : vector<8x1xf32>
    %27 = tpu.matmul %25, %26, %cst_20 {dimension_numbers = #tpu.dot_dimension_numbers<[1], [0], [0], [1], [0, 0, 1, 1], [], []>} : vector<8x256xbf16>, vector<256x1xbf16>, vector<8x1xf32> -> vector<8x1xf32>
    %c0_21 = arith.constant 0 : index
    %c0_22 = arith.constant 0 : index
    %28 = vector.load %arg9[%c0_21, %c0_22] : memref<1x1xf32, #tpu.memory_space<vmem>>, vector<1x1xf32>
    %29 = vector.broadcast %28 : vector<1x1xf32> to vector<8x1xf32>
    %30 = arith.addf %27, %29 : vector<8x1xf32>
    %c0_23 = arith.constant 0 : index
    %c0_24 = arith.constant 0 : index
    %31 = vector.load %arg10[%c0_23, %c0_24] : memref<8x1xf32, #tpu.memory_space<vmem>>, vector<8x1xf32>
    tpu.vector_store %arg10[%c0_23, %c0_24], %30 {strides = array<i32>} : memref<8x1xf32, #tpu.memory_space<vmem>>, vector<8x1xf32>,
    return
  }
  func.func @transform_0(%arg0: i32) -> (i32, i32) {
    %c0_i32 = arith.constant 0 : i32
    %c0_i32_0 = arith.constant 0 : i32
    return %arg0, %c0_i32 : i32, i32
  }
  func.func @transform_1(%arg0: i32) -> (i32, i32) {
    %c0_i32 = arith.constant 0 : i32
    %c0_i32_0 = arith.constant 0 : i32
    %c0_i32_1 = arith.constant 0 : i32
    return %c0_i32, %c0_i32_0 : i32, i32
  }
  func.func @transform_2(%arg0: i32) -> (i32, i32) {
    %c0_i32 = arith.constant 0 : i32
    %c0_i32_0 = arith.constant 0 : i32
    %c0_i32_1 = arith.constant 0 : i32
    return %c0_i32, %c0_i32_0 : i32, i32
  }
  func.func @transform_3(%arg0: i32) -> (i32, i32) {
    %c0_i32 = arith.constant 0 : i32
    %c0_i32_0 = arith.constant 0 : i32
    %c0_i32_1 = arith.constant 0 : i32
    return %c0_i32, %c0_i32_0 : i32, i32
  }
  func.func @transform_4(%arg0: i32) -> (i32, i32) {
    %c0_i32 = arith.constant 0 : i32
    %c0_i32_0 = arith.constant 0 : i32
    %c0_i32_1 = arith.constant 0 : i32
    return %c0_i32, %c0_i32_0 : i32, i32
  }
  func.func @transform_5(%arg0: i32) -> (i32, i32) {
    %c0_i32 = arith.constant 0 : i32
    %c0_i32_0 = arith.constant 0 : i32
    %c0_i32_1 = arith.constant 0 : i32
    return %c0_i32, %c0_i32_0 : i32, i32
  }
  func.func @transform_6(%arg0: i32) -> (i32, i32) {
    %c0_i32 = arith.constant 0 : i32
    %c0_i32_0 = arith.constant 0 : i32
    %c0_i32_1 = arith.constant 0 : i32
    return %c0_i32, %c0_i32_0 : i32, i32
  }
  func.func @transform_7(%arg0: i32) -> (i32, i32) {
    %c0_i32 = arith.constant 0 : i32
    %c0_i32_0 = arith.constant 0 : i32
    %c0_i32_1 = arith.constant 0 : i32
    return %c0_i32, %c0_i32_0 : i32, i32
  }
  func.func @transform_8(%arg0: i32) -> (i32, i32) {
    %c0_i32 = arith.constant 0 : i32
    %c0_i32_0 = arith.constant 0 : i32
    %c0_i32_1 = arith.constant 0 : i32
    return %c0_i32, %c0_i32_0 : i32, i32
  }
  func.func @transform_9(%arg0: i32) -> (i32, i32) {
    %c0_i32 = arith.constant 0 : i32
    %c0_i32_0 = arith.constant 0 : i32
    return %arg0, %c0_i32 : i32, i32
  }
}

</mosaic_0001>

<bundles_post_ra>
// kernel: tpu_custom_call.1
= control target key start
LH: loop header
LB: loop body
LE: loop exit
PB: predicated region body
PF: predicated region fallthrough
CT: control target
= control target key end

     0   :  { %s2216_s0 = inlined_call_operand.vmem [shape: f32[24,32], index: 0, kind: input, shape index: {}]   ;;  %s2217_s1 = inlined_call_operand.vmem [shape: bf16[32,512], index: 1, kind: input, shape index: {}]   ;;  %s2218_s2 = inlined_call_operand.vmem [shape: f32[1,512], index: 2, kind: input, shape index: {}]   ;;  %s2219_s3 = inlined_call_operand.hbm [shape: bf16[512,256], index: 3, kind: input, shape index: {}]   ;;  %s2220_s4 = inlined_call_operand.vmem [shape: f32[1,256], index: 4, kind: input, shape index: {}]   ;;  %s2221_s5 = inlined_call_operand.hbm [shape: bf16[256,256], index: 5, kind: input, shape index: {}]   ;;  %s2222_s6 = inlined_call_operand.vmem [shape: f32[1,256], index: 6, kind: input, shape index: {}]   ;;  %s2223_s7 = inlined_call_operand.vmem [shape: bf16[256,1], index: 7, kind: input, shape index: {}]   ;;  %s2224_s8 = inlined_call_operand.<no memory space> [shape: f32[1,1], index: 8, kind: input, shape index: {}]   ;;  %s2225_s9 = inlined_call_operand.vmem [shape: f32[24,1], index: 9, kind: output, shape index: {}]  }
   0x1   :  { %v14_v0 = vstv %s2224_s8 }
   0x2   :  { %15 = vst [vmem:[#allocation2] sm:$0x1] %v14_v0 }
   0x3   :  { %16 = vsyncpa [#allocation4], 0 }
   0x4   :  { %17 = vsyncpa [#allocation6], 0  ;;  %s2008_s11 = smov 0  }
   0x5 LB: > { %s2014_s12 = sadd.s32 4294967295, %s1948_s11   ;;  %p1512_p0 = scmp.ge.s32.totalorder %s1948_s11, 1  ;;  %s1948_s11 = sphi %s2008_s11, %s23_s11  }
   0x6   : > { %p248_p1 = scmp.lt.s32.totalorder %s1948_s11, 4  ;;  %s1950_s8 = smov [#allocation3]  }
   0x7   : > { %s266_s13 = sshll.u32 %s1950_s8, 4  ;;  %p2226_p3 = scmp.eq.s32.totalorder %s2014_s12, 0  ;;  %s267_s13 = int_to_ptr.vmem [resolvable:$true] %s266_s13 }
   0x8   : > { %p2018_p2 = pnand %p1512_p0, %p248_p1  ;;  %s1951_s15 = smov [#allocation5]  }
   0x9   : > { %s282_s16 = sshll.u32 %s1951_s15, 4  ;;  %s1878_s20 = scalar_lea.hbm %s2219_s3, 8192  ;;  %s2031_s16 = int_to_ptr.vmem [resolvable:$true] %s282_s16 }
   0xa   : > { %s2228_s14 = scalar_select %p2018_p2, 1, 0 }
   0xb   : > { %p1682_p4 = pneg %p2018_p2  ;;  %p1879_p6 = scmp.ne.s32.totalorder %s2219_s3, %s1878_s20 }
   0xc   : > { %p1885_p10 = scmp.lt.u32.totalorder %s1878_s20, %s2219_s3 }
   0xd   : > { %p2027_p5 = pnand %p2226_p3, %p1682_p4 }
   0xf   : > { %p1880_p7 = pneg %p2027_p5 }
  0x11   : > { %p1881_p8 = pnand %p1880_p7, %p1879_p6 }
  0x13   : > { %p1882_p9 = pneg %p1881_p8 }
  0x15   : > { %p1887_p11 = pnand %p1885_p10, %p1882_p9 }
  0x17   : > { %1890 = shalt.err (!%p1887_p11)
}
  0x18   : > { %s1891_s25 = scalar_lea.vmem %s267_s13, 8192  ;;  %p1899_p1 = scmp.lt.s32.totalorder %s267_s13, %s267_s13 }
  0x19   : > { %p1892_p12 = scmp.ne.s32.totalorder %s267_s13, %s1891_s25  ;;  %p1900_p4 = scmp.lt.s32.totalorder %s1891_s25, %s1891_s25 }
  0x1b   : > { %p1894_p13 = pnand %p1892_p12, %p1880_p7  ;;  %p1901_p3 = por %p1900_p4, %p1899_p1 }
  0x1d   : > { %p1895_p0 = pneg %p1894_p13 }
  0x1f   : > { %p1902_p2 = pnand %p1901_p3, %p1895_p0 }
  0x21   : > { %1905 = shalt.err (!%p1902_p2)
}
  0x22   : > { %s1952_s26 = smov 128   ;;  %s1953_s27 = smov 8  }
  0x23   : > { %1685 = dma.hbm_to_vmem [thread:$0]  (!%p2027_p5), %s2219_s3, 8192, %s267_s13, [#allocation4], %s1952_s26, %s1952_s26, %s1953_s27  }
  0x24   : > { %s1906_s8 = scalar_lea.hbm %s2221_s5, 4096 }
  0x25   : > { %p1907_p6 = scmp.ne.s32.totalorder %s2221_s5, %s1906_s8  ;;  %p1913_p8 = scmp.lt.u32.totalorder %s1906_s8, %s2221_s5 }
  0x27   : > { %p1909_p2 = pnand %p1907_p6, %p1880_p7 }
  0x29   : > { %p1910_p3 = pneg %p1909_p2 }
  0x2b   : > { %p1915_p9 = pnand %p1913_p8, %p1910_p3 }
  0x2d   : > { %1918 = shalt.err (!%p1915_p9)
}
  0x2e   : > { %s1919_s13 = scalar_lea.vmem %s2031_s16, 4096  ;;  %p1927_p13 = scmp.lt.s32.totalorder %s2031_s16, %s2031_s16 }
  0x2f   : > { %p1920_p10 = scmp.ne.s32.totalorder %s2031_s16, %s1919_s13  ;;  %p1928_p0 = scmp.lt.s32.totalorder %s1919_s13, %s1919_s13 }
  0x31   : > { %p1922_p11 = pnand %p1920_p10, %p1880_p7  ;;  %p1929_p1 = por %p1928_p0, %p1927_p13 }
  0x33   : > { %p1923_p12 = pneg %p1922_p11 }
  0x35   : > { %p1930_p4 = pnand %p1929_p1, %p1923_p12 }
  0x37   : > { %1933 = shalt.err (!%p1930_p4)
}
  0x38   : > { %1688 = dma.hbm_to_vmem [thread:$0]  (!%p2027_p5), %s2221_s5, 4096, %s2031_s16, [#allocation6], %s1952_s26, %s1952_s26, %s1953_s27  }
  0x39   : > { %p2230_p6 = scmp.ne.s32.totalorder %s2228_s14, 0 }
  0x3a   : > { %p2231_p2 = scmp.eq.s32.totalorder (!%p2230_p6), %s2014_s12, 0 }
  0x3b   : > { %314 = sbr.rel (%p2230_p6) target bundleno = 1021 (0x3fd), region = 56 }
  0x42   : > { %1939 = dma.done.wait (%p2231_p2), [#allocation4], 8192   ;;  %p2232_p7 = pmov %p2231_p2 }
  0x43   : > { %p2233_p3 = pmov %p2231_p2 }
  0x44   : > { %1941 = vsyncadd (%p2232_p7), [#allocation4], 4294959104 }
  0x45   : > { %1943 = dma.done.wait (%p2233_p3), [#allocation6], 4096   ;;  %p2234_p8 = pmov %p2231_p2 }
  0x46   : > { %p352_p9 = scmp.lt.s32.totalorder %s2014_s12, 2  ;;  %v1954_v1 = vmov 0   ;;  %v1706_v2 = vld [vmem:[%s2217_s1 + $0x4] ss:$16 sps:$4 sm:$0xff]   ;;  %v1708_v3 = vld [vmem:[%s2217_s1] ss:$16 sps:$4 sm:$0xff]  }
  0x47   : > { %1945 = vsyncadd (%p2234_p8), [#allocation6], 4294963200  ;;  %469 = vmatprep.mubr.bf16.mxu1 %v1954_v1  ;;  %437 = vmatprep.subr.bf16.mxu1 %v1706_v2  ;;  %v1709_v4 = vld [vmem:[%s2217_s1 + $0x24] ss:$16 sps:$4 sm:$0xff]   ;;  %v1711_v5 = vld [vmem:[%s2217_s1 + $0x20] ss:$16 sps:$4 sm:$0xff]  }
  0x48   : > { %s2236_s12 = smov (!%p352_p9, %s2014_s12), 2  ;;  %438 = vmatpush1.bf16.msra.mxu1 %v1708_v3  ;;  %v1714_v7 = vld [vmem:[%s2217_s1 + $0xc] ss:$16 sps:$4 sm:$0xff]   ;;  %v1712_v8 = vld [vmem:[%s2217_s1 + $0x8] ss:$16 sps:$4 sm:$0xff]   ;;  %vm433_vm0 = vcmask 261120   ;;  %v373_v3 = vlaneseq }
  0x49   : > { %s1519_s14 = sshll.u32 %s2236_s12, 3  ;;  %439 = vmatprep.subr.bf16.mxu1 %v1709_v4  ;;  %v1718_v10 = vld [vmem:[#allocation3 + $0x4] ss:$8 sps:$4 sm:$0xff]   ;;  %v1720_v11 = vld [vmem:[#allocation3] ss:$8 sps:$4 sm:$0xff]   ;;  %vm1433_vm1 = vcmask 7168  }
  0x4a   : > { %s355_s25 = scalar_lea.vmem %s2216_s0, %s1519_s14  ;;  %v1721_v12 = vld [vmem:[#allocation3 + $0x14] ss:$8 sps:$4 sm:$0xff]   ;;  %923 = vmatprep.subr.bf16.mxu0 %v1718_v10  ;;  %v1723_v14 = vld [vmem:[#allocation3 + $0x10] ss:$8 sps:$4 sm:$0xff]   ;;  %v1724_v15 = vld [vmem:[#allocation3 + $0x24] ss:$8 sps:$4 sm:$0xff]   ;;  %s359_s23 = scalar_lea.vmem %s2225_s9, %s1519_s14 }
  0x4b   : > { %v361_v6 = vld [vmem:[%s355_s25] sm:$0xff]  ;;  %v1717_v13 = vld [vmem:[%s2217_s1 + $0x2c] ss:$16 sps:$4 sm:$0xff]   ;;  %924 = vmatpush1.bf16.msra.mxu0 %v1720_v11  ;;  %v1715_v16 = vld [vmem:[%s2217_s1 + $0x28] ss:$16 sps:$4 sm:$0xff]  }
  0x4c   : > { %v362_v9 = vpack.c.bf16 %v361_v6, %v361_v6  ;;  %440 = vmatpush1.bf16.msra.mxu1 %v1711_v5  ;;  %925 = vmatprep.subr.bf16.mxu0 %v1721_v12  ;;  %v1726_v17 = vld [vmem:[#allocation3 + $0x20] ss:$8 sps:$4 sm:$0xff]   ;;  %v1727_v18 = vld [vmem:[#allocation3 + $0x34] ss:$8 sps:$4 sm:$0xff]   ;;  %v1729_v19 = vld [vmem:[#allocation3 + $0x30] ss:$8 sps:$4 sm:$0xff]  }
  0x4d   : > { %478 = vmatprep.subr.bf16.mxu1 %v1714_v7  ;;  %v1730_v20 = vld [vmem:[#allocation3 + $0x44] ss:$8 sps:$4 sm:$0xff]   ;;  %v1732_v21 = vld [vmem:[#allocation3 + $0x40] ss:$8 sps:$4 sm:$0xff]   ;;  %v1733_v22 = vld [vmem:[#allocation3 + $0x54] ss:$8 sps:$4 sm:$0xff]  }
  0x4e   : > { %v1735_v23 = vld [vmem:[#allocation3 + $0x50] ss:$8 sps:$4 sm:$0xff]   ;;  %v1736_v24 = vld [vmem:[#allocation3 + $0x64] ss:$8 sps:$4 sm:$0xff]   ;;  %v1738_v25 = vld [vmem:[#allocation3 + $0x60] ss:$8 sps:$4 sm:$0xff]  }
  0x4f   : > { %1529 = vmatmul.mubr.msk.bf16.vlgmr.msra.gmra.mrb[0].mxu1 %vm433_vm0, %v362_v9  ;;  %926 = vmatpush1.bf16.msra.mxu0 %v1723_v14  ;;  %v1739_v26 = vld [vmem:[#allocation3 + $0x74] ss:$8 sps:$4 sm:$0xff]   ;;  %v1741_v27 = vld [vmem:[#allocation3 + $0x70] ss:$8 sps:$4 sm:$0xff]   ;;  %v1742_v28 = vld [vmem:[#allocation3 + $0x84] ss:$8 sps:$4 sm:$0xff]  }
  0x50   : > { %479 = vmatpush1.bf16.msra.mxu1 %v1712_v8  ;;  %510 = vmatprep.mubr.bf16.mxu1 %v1954_v1  ;;  %v1744_v29 = vld [vmem:[#allocation3 + $0x80] ss:$8 sps:$4 sm:$0xff]   ;;  %v1745_v30 = vld [vmem:[#allocation3 + $0x94] ss:$8 sps:$4 sm:$0xff]   ;;  %v1747_v31 = vld [vmem:[#allocation3 + $0x90] ss:$8 sps:$4 sm:$0xff]  }
  0x51   : > { %480 = vmatprep.subr.bf16.mxu1 %v1717_v13  ;;  %927 = vmatprep.subr.bf16.mxu0 %v1724_v15  ;;  %v1748_v32 = vld [vmem:[#allocation3 + $0xa4] ss:$8 sps:$4 sm:$0xff]   ;;  %v1750_v33 = vld [vmem:[#allocation3 + $0xa0] ss:$8 sps:$4 sm:$0xff]   ;;  %v1751_v34 = vld [vmem:[#allocation3 + $0xb4] ss:$8 sps:$4 sm:$0xff]  }
  0x52   : > { %v1753_v35 = vld [vmem:[#allocation3 + $0xb0] ss:$8 sps:$4 sm:$0xff]   ;;  %v1754_v36 = vld [vmem:[#allocation3 + $0xc4] ss:$8 sps:$4 sm:$0xff]   ;;  %v1756_v37 = vld [vmem:[#allocation3 + $0xc0] ss:$8 sps:$4 sm:$0xff]  }
  0x53   : > { %928 = vmatpush1.bf16.msra.mxu0 %v1726_v17  ;;  %v1757_v38 = vld [vmem:[#allocation3 + $0xd4] ss:$8 sps:$4 sm:$0xff]   ;;  %v1759_v39 = vld [vmem:[#allocation3 + $0xd0] ss:$8 sps:$4 sm:$0xff]   ;;  %v1760_v40 = vld [vmem:[#allocation3 + $0xe4] ss:$8 sps:$4 sm:$0xff]  }
  0x54   : > { %481 = vmatpush1.bf16.msra.mxu1 %v1715_v16  ;;  %929 = vmatprep.subr.bf16.mxu0 %v1727_v18  ;;  %v1762_v41 = vld [vmem:[#allocation3 + $0xe0] ss:$8 sps:$4 sm:$0xff]   ;;  %v1763_v42 = vld [vmem:[#allocation3 + $0xf4] ss:$8 sps:$4 sm:$0xff]   ;;  %v1765_v43 = vld [vmem:[#allocation3 + $0xf0] ss:$8 sps:$4 sm:$0xff]  }
  0x55   : > { %v1768_v44 = vld [vmem:[#allocation3 + $0x104] ss:$8 sps:$4 sm:$0xff]   ;;  %v1814_v45 = vld [vmem:[#allocation5] ss:$8 sps:$4 sm:$0xff]   ;;  %v1819_v47 = vld [vmem:[#allocation5 + $0x14] ss:$8 sps:$4 sm:$0xff]  }
  0x56   : > { %v1816_v46 = vld [vmem:[#allocation5 + $0x4] ss:$8 sps:$4 sm:$0xff]   ;;  %v1817_v48 = vld [vmem:[#allocation5 + $0x10] ss:$8 sps:$4 sm:$0xff]   ;;  %v1820_v50 = vld [vmem:[#allocation5 + $0x20] ss:$8 sps:$4 sm:$0xff]  }
  0x57   : > { %1530 = vmatmul.mubr.msk.bf16.vlgmr.msra.gmra.mrb[4].mxu1 %vm433_vm0, %v362_v9  ;;  %930 = vmatpush1.bf16.msra.mxu0 %v1729_v19  ;;  %v1822_v49 = vld [vmem:[#allocation5 + $0x24] ss:$8 sps:$4 sm:$0xff]   ;;  %v1825_v51 = vld [vmem:[#allocation5 + $0x34] ss:$8 sps:$4 sm:$0xff]   ;;  %v1823_v52 = vld [vmem:[#allocation5 + $0x30] ss:$8 sps:$4 sm:$0xff]  }
  0x58   : > { %931 = vmatprep.subr.bf16.mxu0 %v1730_v20  ;;  %1213 = vmatprep.subr.bf16.mxu1 %v1816_v46  ;;  %v1828_v53 = vld [vmem:[#allocation5 + $0x44] ss:$8 sps:$4 sm:$0xff]   ;;  %v1826_v54 = vld [vmem:[#allocation5 + $0x40] ss:$8 sps:$4 sm:$0xff]   ;;  %v1831_v55 = vld [vmem:[#allocation5 + $0x54] ss:$8 sps:$4 sm:$0xff]  }
  0x59   : > { %1214 = vmatpush1.bf16.msra.mxu1 %v1814_v45  ;;  %v1829_v56 = vld [vmem:[#allocation5 + $0x50] ss:$8 sps:$4 sm:$0xff]   ;;  %v1834_v57 = vld [vmem:[#allocation5 + $0x64] ss:$8 sps:$4 sm:$0xff]   ;;  %v1832_v58 = vld [vmem:[#allocation5 + $0x60] ss:$8 sps:$4 sm:$0xff]  }
  0x5a   : > { %1215 = vmatprep.subr.bf16.mxu1 %v1819_v47  ;;  %v1837_v59 = vld [vmem:[#allocation5 + $0x74] ss:$8 sps:$4 sm:$0xff]   ;;  %v1835_v60 = vld [vmem:[#allocation5 + $0x70] ss:$8 sps:$4 sm:$0xff]   ;;  %v1840_v61 = vld [vmem:[#allocation5 + $0x84] ss:$8 sps:$4 sm:$0xff]  }
  0x5b   : > { %932 = vmatpush1.bf16.msra.mxu0 %v1732_v21  ;;  %v1838_v62 = vld [vmem:[#allocation5 + $0x80] ss:$8 sps:$4 sm:$0xff]   ;;  %v1843_v63 = vld [vmem:[#allocation5 + $0x94] ss:$8 sps:$4 sm:$0xff]   ;;  %v1841_v0 = vld [vmem:[#allocation5 + $0x90] ss:$8 sps:$4 sm:$0xff]  }
  0x5c   : > { %933 = vmatprep.subr.bf16.mxu0 %v1733_v22  ;;  %v1846_v1 = vld [vmem:[#allocation5 + $0xa4] ss:$8 sps:$4 sm:$0xff]   ;;  %v1844_v2 = vld [vmem:[#allocation5 + $0xa0] ss:$8 sps:$4 sm:$0xff]   ;;  %v1849_v4 = vld [vmem:[#allocation5 + $0xb4] ss:$8 sps:$4 sm:$0xff]  }
  0x5d   : > { %1216 = vmatpush1.bf16.msra.mxu1 %v1817_v48  ;;  %v1847_v5 = vld [vmem:[#allocation5 + $0xb0] ss:$8 sps:$4 sm:$0xff]   ;;  %v2126_v6 = vshrl.u32 %v373_v3, 7  ;;  %v1852_v7 = vld [vmem:[#allocation5 + $0xc4] ss:$8 sps:$4 sm:$0xff]  }
  0x5e   : > { %1217 = vmatprep.subr.bf16.mxu1 %v1822_v49  ;;  %v1850_v8 = vld [vmem:[#allocation5 + $0xc0] ss:$8 sps:$4 sm:$0xff]   ;;  %v1855_v10 = vld [vmem:[#allocation5 + $0xd4] ss:$8 sps:$4 sm:$0xff]   ;;  %v1853_v13 = vld [vmem:[#allocation5 + $0xd0] ss:$8 sps:$4 sm:$0xff]  }
  0x5f   : > { %934 = vmatpush1.bf16.msra.mxu0 %v1735_v23  ;;  %v2129_v9 = vsub.s32 0, %v2126_v6  ;;  %v2134_v11 = vld [vmem:[%s2218_s2] sm:$0xf]  ;;  %v2137_v12 = vsub.s32 1, %v2126_v6  ;;  %v387_v21 = vsub.s32 3, %v2126_v6 }
  0x60   : > { %935 = vmatprep.subr.bf16.mxu0 %v1736_v24  ;;  %v1781_v45 = vld [vmem:[#allocation3 + $0x150] ss:$8 sps:$4 sm:$0xff]   ;;  %v1786_v46 = vld [vmem:[#allocation3 + $0x164] ss:$8 sps:$4 sm:$0xff]   ;;  %v1784_v47 = vld [vmem:[#allocation3 + $0x160] ss:$8 sps:$4 sm:$0xff]  }
  0x61   : > { %1218 = vmatpush1.bf16.msra.mxu1 %v1820_v50  ;;  %v376_v14 = vrot.slane %v2134_v11, %v2129_v9  ;;  %v380_v15 = vrot.slane %v2134_v11, %v2137_v12  ;;  %v1789_v48 = vld [vmem:[#allocation3 + $0x174] ss:$8 sps:$4 sm:$0xff]   ;;  %v1787_v49 = vld [vmem:[#allocation3 + $0x170] ss:$8 sps:$4 sm:$0xff]   ;;  %v1792_v50 = vld [vmem:[#allocation3 + $0x184] ss:$8 sps:$4 sm:$0xff]  }
  0x62   : > { %1219 = vmatprep.subr.bf16.mxu1 %v1825_v51  ;;  %v1790_v51 = vld [vmem:[#allocation3 + $0x180] ss:$8 sps:$4 sm:$0xff]   ;;  %v1813_v3 = vld [vmem:[#allocation3 + $0x1f4] ss:$8 sps:$4 sm:$0xff]  }
  0x63   : > { %936 = vmatpush1.bf16.msra.mxu0 %v1738_v25 }
  0x64   : > { %937 = vmatprep.subr.bf16.mxu0 %v1739_v26  ;;  %v1766_v26 = vld [vmem:[#allocation3 + $0x100] ss:$8 sps:$4 sm:$0xff]  }
  0x65   : > { %1220 = vmatpush1.bf16.msra.mxu1 %v1823_v52  ;;  %v1795_v52 = vld [vmem:[#allocation3 + $0x194] ss:$8 sps:$4 sm:$0xff]  }
  0x66   : > { %1221 = vmatprep.subr.bf16.mxu1 %v1828_v53  ;;  %v1793_v53 = vld [vmem:[#allocation3 + $0x190] ss:$8 sps:$4 sm:$0xff]  }
  0x67   : > { %938 = vmatpush1.bf16.msra.mxu0 %v1741_v27  ;;  %v388_v27 = vrot.slane %v2134_v11, %v387_v21 }
  0x68   : > { %939 = vmatprep.subr.bf16.mxu0 %v1742_v28 }
  0x69   : > { %1222 = vmatpush1.bf16.msra.mxu1 %v1826_v54  ;;  %v1798_v54 = vld [vmem:[#allocation3 + $0x1a4] ss:$8 sps:$4 sm:$0xff]  }
  0x6a   : > { %1223 = vmatprep.subr.bf16.mxu1 %v1831_v55  ;;  %v1796_v55 = vld [vmem:[#allocation3 + $0x1a0] ss:$8 sps:$4 sm:$0xff]  }
  0x6b   : > { %940 = vmatpush1.bf16.msra.mxu0 %v1744_v29  ;;  %v1771_v29 = vld [vmem:[#allocation3 + $0x114] ss:$8 sps:$4 sm:$0xff]  }
  0x6c   : > { %941 = vmatprep.subr.bf16.mxu0 %v1745_v30 }
  0x6d   : > { %1224 = vmatpush1.bf16.msra.mxu1 %v1829_v56  ;;  %v1801_v56 = vld [vmem:[#allocation3 + $0x1b4] ss:$8 sps:$4 sm:$0xff]  }
  0x6e   : > { %1225 = vmatprep.subr.bf16.mxu1 %v1834_v57  ;;  %v1799_v57 = vld [vmem:[#allocation3 + $0x1b0] ss:$8 sps:$4 sm:$0xff]  }
  0x6f   : > { %942 = vmatpush1.bf16.msra.mxu0 %v1747_v31 }
  0x70   : > { %943 = vmatprep.subr.bf16.mxu0 %v1748_v32  ;;  %v1769_v32 = vld [vmem:[#allocation3 + $0x110] ss:$8 sps:$4 sm:$0xff]  }
  0x71   : > { %1226 = vmatpush1.bf16.msra.mxu1 %v1832_v58  ;;  %v1804_v58 = vld [vmem:[#allocation3 + $0x1c4] ss:$8 sps:$4 sm:$0xff]  }
  0x72   : > { %1227 = vmatprep.subr.bf16.mxu1 %v1837_v59  ;;  %v1802_v59 = vld [vmem:[#allocation3 + $0x1c0] ss:$8 sps:$4 sm:$0xff]  }
  0x73   : > { %944 = vmatpush1.bf16.msra.mxu0 %v1750_v33 }
  0x74   : > { %945 = vmatprep.subr.bf16.mxu0 %v1751_v34 }
  0x75   : > { %1228 = vmatpush1.bf16.msra.mxu1 %v1835_v60  ;;  %v383_v60 = vsub.s32 2, %v2126_v6  ;;  %v1858_v6 = vld [vmem:[#allocation5 + $0xe4] ss:$8 sps:$4 sm:$0xff]  }
  0x76   : > { %1229 = vmatprep.subr.bf16.mxu1 %v1840_v61  ;;  %v1807_v61 = vld [vmem:[#allocation3 + $0x1d4] ss:$8 sps:$4 sm:$0xff]  }
  0x77   : > { %946 = vmatpush1.bf16.msra.mxu0 %v1753_v35  ;;  %v1774_v35 = vld [vmem:[#allocation3 + $0x124] ss:$8 sps:$4 sm:$0xff]  }
  0x78   : > { %947 = vmatprep.subr.bf16.mxu0 %v1754_v36 }
  0x79   : > { %1230 = vmatpush1.bf16.msra.mxu1 %v1838_v62  ;;  %v1805_v62 = vld [vmem:[#allocation3 + $0x1d0] ss:$8 sps:$4 sm:$0xff]  }
  0x7a   : > { %1231 = vmatprep.subr.bf16.mxu1 %v1843_v63  ;;  %v384_v63 = vrot.slane %v2134_v11, %v383_v60  ;;  %v1859_v11 = vld [vmem:[#allocation5 + $0xf0] ss:$8 sps:$4 sm:$0xff]  }
  0x7b   : > { %948 = vmatpush1.bf16.msra.mxu0 %v1756_v37 }
  0x7c   : > { %949 = vmatprep.subr.bf16.mxu0 %v1757_v38  ;;  %v1772_v38 = vld [vmem:[#allocation3 + $0x120] ss:$8 sps:$4 sm:$0xff]  }
  0x7d   : > { %1232 = vmatpush1.bf16.msra.mxu1 %v1841_v0  ;;  %v1810_v0 = vld [vmem:[#allocation3 + $0x1e4] ss:$8 sps:$4 sm:$0xff]  }
  0x7e   : > { %1233 = vmatprep.subr.bf16.mxu1 %v1846_v1  ;;  %v1808_v1 = vld [vmem:[#allocation3 + $0x1e0] ss:$8 sps:$4 sm:$0xff]  }
  0x7f   : > { %950 = vmatpush1.bf16.msra.mxu0 %v1759_v39 }
  0x80   : > { %951 = vmatprep.subr.bf16.mxu0 %v1760_v40  ;;  %v1777_v40 = vld [vmem:[#allocation3 + $0x134] ss:$8 sps:$4 sm:$0xff]  }
  0x81   : > { %1234 = vmatpush1.bf16.msra.mxu1 %v1844_v2 }
  0x82   : > { %1235 = vmatprep.subr.bf16.mxu1 %v1849_v4  ;;  %v1811_v4 = vld [vmem:[#allocation3 + $0x1f0] ss:$8 sps:$4 sm:$0xff]  }
  0x83   : > { %952 = vmatpush1.bf16.msra.mxu0 %v1762_v41  ;;  %v1775_v41 = vld [vmem:[#allocation3 + $0x130] ss:$8 sps:$4 sm:$0xff]  }
  0x84   : > { %953 = vmatprep.subr.bf16.mxu0 %v1763_v42  ;;  %v1780_v42 = vld [vmem:[#allocation3 + $0x144] ss:$8 sps:$4 sm:$0xff]  }
  0x85   : > { %1236 = vmatpush1.bf16.msra.mxu1 %v1847_v5 }
  0x86   : > { %1237 = vmatprep.subr.bf16.mxu1 %v1852_v7 }
  0x87   : > { %954 = vmatpush1.bf16.msra.mxu0 %v1765_v43  ;;  %v1778_v43 = vld [vmem:[#allocation3 + $0x140] ss:$8 sps:$4 sm:$0xff]  }
  0x88   : > { %964 = vmatprep.subr.bf16.mxu0 %v1768_v44  ;;  %v1783_v44 = vld [vmem:[#allocation3 + $0x154] ss:$8 sps:$4 sm:$0xff]  }
  0x89   : > { %1238 = vmatpush1.bf16.msra.mxu1 %v1850_v8  ;;  %v1856_v8 = vld [vmem:[#allocation5 + $0xe0] ss:$8 sps:$4 sm:$0xff]  }
  0x8a   : > { %1239 = vmatprep.subr.bf16.mxu1 %v1855_v10  ;;  %v1861_v10 = vld [vmem:[#allocation5 + $0xf4] ss:$8 sps:$4 sm:$0xff]  }
  0x8d   : > { %1240 = vmatpush1.bf16.msra.mxu1 %v1853_v13  ;;  %v1862_v13 = vld [vmem:[%s2223_s7 + $0x40] sm:$0xff]  }
  0x8e   : > { %1241 = vmatprep.subr.bf16.mxu1 %v1858_v6 }
  0x91   : > { %1242 = vmatpush1.bf16.msra.mxu1 %v1856_v8 }
  0x92   : > { %1243 = vmatprep.subr.bf16.mxu1 %v1861_v10 }
  0x95   : > { %1244 = vmatpush1.bf16.msra.mxu1 %v1859_v11 }
  0x96   : > { %1646 = vmatprep.subr.bf16.mxu1 %v1862_v13 }
 0x122   : > { %v471_v16 = vpop.f32.mrb[0].mxu1 }
 0x123   : > { %v472_v17 = vadd.f32 %v471_v16, %v376_v14  ;;  %v473_v18 = vpop.f32.mrb[1].mxu1  ;;  %v591_v14 = vld [vmem:[%s2220_s4] sm:$0x3] }
 0x124   : > { %v474_v19 = vadd.f32 %v473_v18, %v380_v15  ;;  %v475_v20 = vpop.f32.mrb[2].mxu1  ;;  %v596_v15 = vrot.slane %v591_v14, %v2129_v9  ;;  %v600_v16 = vrot.slane %v591_v14, %v2137_v12 }
 0x125   : > { %v519_v22 = vmax.f32 %v472_v17, 0.0  ;;  %v476_v23 = vpop.f32.mrb[3].mxu1 }
 0x126   : > { %v520_v24 = vmax.f32 %v474_v19, 0.0 }
 0x127   : > { %v523_v28 = vpack.c.bf16 %v519_v22, %v519_v22 }
 0x128   : > { %v524_v25 = vpack.c.bf16 %v520_v24, %v520_v24 }
 0x12a   : > { %955 = vmatprep.mubr.bf16.mxu0 %v524_v25  ;;  %v2145_v30 = vpop.f32.mrb[4].mxu1 }
 0x12b   : > { %956 = vmatmul.mubr.bf16.vlgmr.msra.gmra.mrb[0].mxu0 %v523_v28  ;;  %v514_v31 = vpop.f32.mrb[5].mxu1  ;;  %v513_v2 = vadd.f32 %v2145_v30, %v384_v63  ;;  %v1864_v28 = vld [vmem:[%s2223_s7 + $0x48] sm:$0xff]   ;;  %v1866_v30 = vld [vmem:[%s2223_s7 + $0x50] sm:$0xff]  }
 0x12c   : > { %965 = vmatpush1.bf16.msra.mxu0 %v1766_v26  ;;  %v515_v33 = vadd.f32 %v514_v31, %v388_v27  ;;  %v516_v34 = vpop.f32.mrb[6].mxu1  ;;  %v1863_v26 = vld [vmem:[%s2223_s7] sm:$0xff]   ;;  %v1867_v31 = vld [vmem:[%s2223_s7 + $0x10] sm:$0xff]  }
 0x12d   : > { %966 = vmatprep.subr.bf16.mxu0 %v1771_v29  ;;  %v517_v36 = vpop.f32.mrb[7].mxu1  ;;  %v521_v5 = vmax.f32 %v513_v2, 0.0  ;;  %v1865_v29 = vld [vmem:[%s2223_s7 + $0x8] sm:$0xff]   ;;  %v1870_v34 = vld [vmem:[%s2223_s7 + $0x60] sm:$0xff]  }
 0x12e   : > { %v522_v37 = vmax.f32 %v515_v33, 0.0  ;;  %v1869_v33 = vld [vmem:[%s2223_s7 + $0x18] sm:$0xff]   ;;  %v1872_v36 = vld [vmem:[%s2223_s7 + $0x68] sm:$0xff]  }
 0x12f   : > { %v525_v7 = vpack.c.bf16 %v521_v5, %v521_v5 }
 0x130   : > { %967 = vmatpush1.bf16.msra.mxu0 %v1769_v32  ;;  %v526_v39 = vpack.c.bf16 %v522_v37, %v522_v37  ;;  %v1868_v32 = vld [vmem:[%s2223_s7 + $0x58] sm:$0xff]   ;;  %v1873_v37 = vld [vmem:[%s2223_s7 + $0x28] sm:$0xff]  }
 0x131   : > { %968 = vmatprep.subr.bf16.mxu0 %v1774_v35  ;;  %v1871_v35 = vld [vmem:[%s2223_s7 + $0x20] sm:$0xff]  }
 0x132   : > { %996 = vmatprep.mubr.bf16.mxu0 %v526_v39  ;;  %v1875_v39 = vld [vmem:[%s2223_s7 + $0x30] sm:$0xff]  }
 0x134   : > { %969 = vmatpush1.bf16.msra.mxu0 %v1772_v38  ;;  %v1874_v38 = vld [vmem:[%s2223_s7 + $0x70] sm:$0xff]  }
 0x135   : > { %970 = vmatprep.subr.bf16.mxu0 %v1777_v40  ;;  %v1876_v40 = vld [vmem:[%s2223_s7 + $0x78] sm:$0xff]  }
 0x138   : > { %971 = vmatpush1.bf16.msra.mxu0 %v1775_v41  ;;  %v1877_v41 = vld [vmem:[%s2223_s7 + $0x38] sm:$0xff]  }
 0x139   : > { %972 = vmatprep.subr.bf16.mxu0 %v1780_v42  ;;  %v1041_v42 = vld [vmem:[%s2222_s6] sm:$0x3] }
 0x13c   : > { %973 = vmatpush1.bf16.msra.mxu0 %v1778_v43  ;;  %v1046_v43 = vrot.slane %v1041_v42, %v2129_v9 }
 0x13d   : > { %974 = vmatprep.subr.bf16.mxu0 %v1783_v44  ;;  %v1050_v44 = vrot.slane %v1041_v42, %v2137_v12 }
 0x140   : > { %975 = vmatpush1.bf16.msra.mxu0 %v1781_v45 }
 0x141   : > { %976 = vmatprep.subr.bf16.mxu0 %v1786_v46 }
 0x144   : > { %977 = vmatpush1.bf16.msra.mxu0 %v1784_v47 }
 0x145   : > { %978 = vmatprep.subr.bf16.mxu0 %v1789_v48 }
 0x148   : > { %979 = vmatpush1.bf16.msra.mxu0 %v1787_v49 }
 0x149   : > { %980 = vmatprep.subr.bf16.mxu0 %v1792_v50 }
 0x14c   : > { %981 = vmatpush1.bf16.msra.mxu0 %v1790_v51 }
 0x14d   : > { %982 = vmatprep.subr.bf16.mxu0 %v1795_v52 }
 0x150   : > { %983 = vmatpush1.bf16.msra.mxu0 %v1793_v53 }
 0x151   : > { %984 = vmatprep.subr.bf16.mxu0 %v1798_v54 }
 0x154   : > { %985 = vmatpush1.bf16.msra.mxu0 %v1796_v55 }
 0x155   : > { %986 = vmatprep.subr.bf16.mxu0 %v1801_v56  ;;  %v1627_v56 = vld [vmem:[#allocation2] ss:$0 sm:$0xff] }
 0x158   : > { %987 = vmatpush1.bf16.msra.mxu0 %v1799_v57 }
 0x159   : > { %988 = vmatprep.subr.bf16.mxu0 %v1804_v58 }
 0x15c   : > { %989 = vmatpush1.bf16.msra.mxu0 %v1802_v59 }
 0x15d   : > { %990 = vmatprep.subr.bf16.mxu0 %v1807_v61 }
 0x160   : > { %991 = vmatpush1.bf16.msra.mxu0 %v1805_v62 }
 0x161   : > { %992 = vmatprep.subr.bf16.mxu0 %v1810_v0 }
 0x164   : > { %993 = vmatpush1.bf16.msra.mxu0 %v1808_v1 }
 0x165   : > { %994 = vmatprep.subr.bf16.mxu0 %v1813_v3 }
 0x168   : > { %995 = vmatpush1.bf16.msra.mxu0 %v1811_v4 }
 0x16b   : > { %997 = vmatmul.mubr.bf16.vlgmr.msra.gmra.mrb[0].mxu0 %v525_v7 }
 0x23e   : > { %v998_v17 = vpop.f32.mrb[0].mxu0 }
 0x23f   : > { %v1668_v18 = vadd.f32 %v998_v17, %v596_v15  ;;  %v1000_v19 = vpop.f32.mrb[1].mxu0 }
 0x240   : > { %v1669_v20 = vadd.f32 %v1000_v19, %v600_v16  ;;  %v1002_v21 = vpop.f32.mrb[2].mxu0 }
 0x241   : > { %v1005_v22 = vmax.f32 %v1668_v18, 0.0  ;;  %v1003_v23 = vpop.f32.mrb[3].mxu0 }
 0x242   : > { %v1006_v24 = vmax.f32 %v1669_v20, 0.0 }
 0x243   : > { %v1007_v27 = vpack.c.bf16 %v1005_v22, %v1005_v22 }
 0x244   : > { %v1008_v25 = vpack.c.bf16 %v1006_v24, %v1006_v24 }
 0x246   : > { %1245 = vmatprep.mubr.bf16.mxu1 %v1008_v25 }
 0x247   : > { %1246 = vmatmul.mubr.bf16.vlgmr.msra.gmra.mrb[8].mxu1 %v1007_v27 }
 0x248   : > { %1647 = vmatpush3.bf16.msra.mxu1 %v1863_v26 }
 0x249   : > { %1648 = vmatprep.subr.bf16.mxu1 %v1864_v28 }
 0x24c   : > { %1649 = vmatpush3.bf16.msra.mxu1 %v1865_v29 }
 0x24d   : > { %1650 = vmatprep.subr.bf16.mxu1 %v1866_v30 }
 0x250   : > { %1651 = vmatpush3.bf16.msra.mxu1 %v1867_v31 }
 0x251   : > { %1652 = vmatprep.subr.bf16.mxu1 %v1868_v32 }
 0x254   : > { %1653 = vmatpush3.bf16.msra.mxu1 %v1869_v33 }
 0x255   : > { %1654 = vmatprep.subr.bf16.mxu1 %v1870_v34 }
 0x258   : > { %1655 = vmatpush3.bf16.msra.mxu1 %v1871_v35 }
 0x259   : > { %1656 = vmatprep.subr.bf16.mxu1 %v1872_v36 }
 0x25c   : > { %1657 = vmatpush3.bf16.msra.mxu1 %v1873_v37 }
 0x25d   : > { %1658 = vmatprep.subr.bf16.mxu1 %v1874_v38 }
 0x260   : > { %1659 = vmatpush3.bf16.msra.mxu1 %v1875_v39 }
 0x261   : > { %1660 = vmatprep.subr.bf16.mxu1 %v1876_v40 }
 0x264   : > { %1661 = vmatpush3.bf16.msra.mxu1 %v1877_v41 }
 0x31a   : > { %v1247_v45 = vpop.f32.mrb[8].mxu1 }
 0x31b   : > { %v1248_v46 = vadd.f32 %v1247_v45, %v1046_v43  ;;  %v1249_v47 = vpop.f32.mrb[9].mxu1 }
 0x31c   : > { %v1250_v48 = vadd.f32 %v1249_v47, %v1050_v44  ;;  %v1251_v49 = vpop.f32.mrb[10].mxu1 }
 0x31d   : > { %v1254_v50 = vmax.f32 %v1248_v46, 0.0  ;;  %v1252_v51 = vpop.f32.mrb[11].mxu1 }
 0x31e   : > { %v1255_v52 = vmax.f32 %v1250_v48, 0.0 }
 0x31f   : > { %v1256_v54 = vpack.c.bf16 %v1254_v50, %v1254_v50 }
 0x320   : > { %v1257_v53 = vpack.c.bf16 %v1255_v52, %v1255_v52 }
 0x322   : > { %1425 = vmatprep.mubr.bf16.mxu1 %v1257_v53 }
 0x323   : > { %1426 = vmatmul.mubr.bf16.vlgmr.msra.gmra.mrb[12].mxu1 %v1256_v54 }
 0x3f6   : > { %v1662_v55 = vpop.f32.mrb[12].mxu1 }
 0x3f7   : > { %v1663_v57 = vpop.f32.mrb[13].mxu1 }
 0x3f8   : > { %v1664_v58 = vadd.f32 %v1663_v57, %v1662_v55  ;;  %v1665_v9 = vpop.f32.mrb[14].mxu1 }
 0x3f9   : > { %v1666_v12 = vpop.f32.mrb[15].mxu1 }
 0x3fa   : > { %v1428_v59 = vadd.f32 %v1664_v58, %v1627_v56 }
 0x3fc   : > { %1434 = vst.msk [vmem:[%s359_s23] sm:$0xff] %vm1433_vm1, %v1428_v59 }
 0x3fd PF: > { %s23_s11 = sadd.s32 1, %s1948_s11  }
 0x3fe   : > { %p20_p5 = scmp.ge.s32.totalorder %s23_s11, 5  }
 0x400   :  { %22 = sbr.rel (!%p20_p5) target bundleno = 5 (0x5), region = 95 }
 0x407   :  { %1454 = vsyncpa [#allocation4], 1 }
 0x408   :  { %1456 = vsyncpa [#allocation4 + $0x1], 1 }
 0x409   :  { %1457 = vsyncpa [#allocation6], 1 }

</bundles_post_ra>
